<compile_context>
chip_gen: v5e
topology: v5e:2x2
jax: 0.10.0
libtpu: 0.0.40
codegen_flags: <defaults>
</compile_context>

<pallas_src>
import jax
import jax.numpy as jnp
from jax import lax
from jax.experimental import pallas as pl
from jax.experimental.pallas import tpu as pltpu


def _round_up(x, m):
    return ((x + m - 1) // m) * m


# ---------------------------------------------------------------------------
# Stage 1: input projection  gi = x @ [W_ir|W_iz|W_in] + b   (tiled matmul)
#   x, w are bf16; accumulate f32; bias add f32; store bf16.
# ---------------------------------------------------------------------------
def _input_proj_kernel(x_ref, w_ref, b_ref, o_ref):
    acc = jnp.dot(x_ref[...], w_ref[...], preferred_element_type=jnp.float32)
    o_ref[...] = (acc + b_ref[...]).astype(o_ref.dtype)


def _input_projection(x_flat, w, b, *, tm=512):
    """x_flat: (M, Ep) bf16, w: (Ep, N) bf16, b: (1, N) f32 -> (M, N) bf16."""
    M, Ep = x_flat.shape
    N = w.shape[1]
    tm = min(tm, _round_up(M, 8))
    Mp = _round_up(M, tm)
    x_p = jnp.pad(x_flat, ((0, Mp - M), (0, 0)))

    out = pl.pallas_call(
        _input_proj_kernel,
        out_shape=jax.ShapeDtypeStruct((Mp, N), jnp.bfloat16),
        grid_spec=pltpu.PrefetchScalarGridSpec(
            num_scalar_prefetch=0,
            grid=(Mp // tm,),
            in_specs=[
                pl.BlockSpec((tm, Ep), lambda i: (i, 0)),
                pl.BlockSpec((Ep, N), lambda i: (0, 0)),
                pl.BlockSpec((1, N), lambda i: (0, 0)),
            ],
            out_specs=pl.BlockSpec((tm, N), lambda i: (i, 0)),
        ),
        compiler_params=pltpu.CompilerParams(
            dimension_semantics=("parallel",)),
    )(x_p, w, b)
    return out[:M]


# ---------------------------------------------------------------------------
# Stage 2: masked GRU recurrence over time chunks (output = carried h)
# ---------------------------------------------------------------------------
def gru_recurrent_kernel(gi_ref, len_ref, w_h_ref, b_hn_ref, h_ref):
    # gi_ref:  (Tc, Bb, 3*Hp) bf16   precomputed x@W_i + (b_i + b_h[r,z])
    # len_ref: (Bb, 1) int32         true sequence lengths
    # w_h_ref: (Hp, 3*Hp) bf16       fused hidden weights (gate order r,z,n)
    # b_hn_ref:(1, Hp) f32           hidden bias of the n gate (scaled by r)
    # h_ref:   (Bb, Hp) f32          output block; carried across time chunks
    t_chunk = pl.program_id(1)
    Tc, Bb, threeHp = gi_ref.shape
    Hp = threeHp // 3

    @pl.when(t_chunk == 0)
    def _():
        h_ref[...] = jnp.zeros_like(h_ref)

    # Hoisted out of the step loop (JAX does not CSE broadcast_in_dim).
    lens = len_ref[...]                                            # (Bb, 1)
    b_hn = pl.broadcast_to(b_hn_ref[...], (Bb, Hp))                # (Bb, Hp)
    t_base = t_chunk * Tc

    def step(i, h):
        gi = gi_ref[i].astype(jnp.float32)                         # (Bb, 3*Hp)
        h_b = h.astype(jnp.bfloat16)
        # Split matmul: r/z columns pop first so sigmoid (EUP) overlaps the
        # n-column MXU push.  W_h read (bf16) inside the step: no f32 weight
        # value pinned across the unrolled loop.
        gh_rz = jnp.dot(h_b, w_h_ref[:, 0:2 * Hp],
                        preferred_element_type=jnp.float32)        # (Bb, 2*Hp)
        gh_n = jnp.dot(h_b, w_h_ref[:, 2 * Hp:3 * Hp],
                       preferred_element_type=jnp.float32)         # (Bb, Hp)
        r = jax.nn.sigmoid(gi[:, 0:Hp] + gh_rz[:, 0:Hp])
        # 1 - z, computed directly (b_hz already folded into gi).
        omz = jax.nn.sigmoid(-(gi[:, Hp:2 * Hp] + gh_rz[:, Hp:2 * Hp]))
        n = jnp.tanh(gi[:, 2 * Hp:3 * Hp] + r * (gh_n + b_hn))
        # packed-sequence semantics: freeze rows once t >= doc_len[b]
        m = (lens > (t_base + i)).astype(jnp.float32)              # (Bb, 1)
        # h_new = (1-z)*n + z*h ; masked blend = h + m*(1-z)*(n-h)
        return h + (m * omz) * (n - h)

    h_ref[...] = lax.fori_loop(0, Tc, step, h_ref[...], unroll=2)


# ---------------------------------------------------------------------------
# Wrapper: embedding gather, padding / gate packing, two pallas_calls
# ---------------------------------------------------------------------------
def gru_encoder_forward(batch_ids, doc_len, params, *, t_chunk=32,
                        max_batch_block=256):
    """batch_ids: (B, T) int32 token ids, doc_len: (B,) int32 lengths."""
    emb_tbl = params["embedding"]
    H = params["w_hr"].shape[0]
    E = emb_tbl.shape[1]
    B, T = batch_ids.shape

    Hp = _round_up(H, 128)                 # lane-dense gate blocks
    Ep = _round_up(E, 128)                 # lane-aligned K for stage 1

    # Batch block: >= 2 blocks when possible so the 'parallel' batch axis can
    # be sharded across v7x's two TensorCores; cap at 256 rows for the
    # 256-wide MXU on v6e/v7x (pass max_batch_block=128 on v5e).
    Bp8 = _round_up(B, 8)
    if Bp8 >= 16:
        Bb = min(_round_up(-(-Bp8 // 2), 8), max_batch_block)
    else:
        Bb = Bp8
    Bp = _round_up(Bp8, Bb)

    Tc = min(t_chunk, T)                   # time chunk (VMEM budget knob)
    Tp = _round_up(T, Tc)

    # ---- glue: embedding gather + time-major layout + padding (XLA side) ----
    emb = emb_tbl[batch_ids].astype(jnp.bfloat16)                # (B, T, E)
    emb = jnp.transpose(emb, (1, 0, 2))                          # (T, B, E)
    emb = jnp.pad(emb, ((0, Tp - T), (0, Bp - B), (0, Ep - E)))  # (Tp, Bp, Ep)

    # ---- pack gate weights: pad each gate to Hp lanes, concat (r|z|n) ----
    def pad_gate(w):
        return jnp.pad(w, ((0, 0), (0, Hp - H)))

    w_i = jnp.concatenate([pad_gate(params["w_ir"]),
                           pad_gate(params["w_iz"]),
                           pad_gate(params["w_in"])], axis=1)    # (E, 3*Hp)
    w_i = jnp.pad(w_i, ((0, Ep - E), (0, 0))).astype(jnp.bfloat16)

    w_h = jnp.concatenate([pad_gate(params["w_hr"]),
                           pad_gate(params["w_hz"]),
                           pad_gate(params["w_hn"])], axis=1)    # (H, 3*Hp)
    w_h = jnp.pad(w_h, ((0, Hp - H), (0, 0))).astype(jnp.bfloat16)

    # b_hr / b_hz folded into the input-projection bias (they are plain adds);
    # b_hn must stay separate because it is scaled by r in the n gate.
    b_i = jnp.concatenate([pad_gate(params["b_ir"] + params["b_hr"]),
                           pad_gate(params["b_iz"] + params["b_hz"]),
                           pad_gate(params["b_in"])], axis=1)    # (1, 3*Hp) f32
    b_hn = pad_gate(params["b_hn"]).astype(jnp.float32)          # (1, Hp)

    # ---- stage 1: one big input projection (hoisted out of the recurrence) --
    gi = _input_projection(emb.reshape(Tp * Bp, Ep), w_i, b_i)   # (Tp*Bp,3Hp) bf16
    gi = gi.reshape(Tp, Bp, 3 * Hp)

    lens = jnp.zeros((Bp, 1), jnp.int32).at[:B, 0].set(doc_len.astype(jnp.int32))

    nb = Bp // Bb
    nt = Tp // Tc

    # ---- VMEM budget (double-buffered bf16 gi is the big item) -------------
    gi_chunk = Tc * Bb * 3 * Hp * 2          # bf16
    vmem_budget = (2 * gi_chunk              # gi double buffer
                   + 2 * Bb * Hp * 4         # resident output carry
                   + 2 * Hp * 3 * Hp * 2     # w_h (bf16)
                   + 2 * Bb * 128 * 4        # lens (lane-padded)
                   + 2 * 8 * Hp * 4)         # b_hn (sublane-padded)
    vmem_limit = int(min(max(vmem_budget + (8 << 20), 32 << 20), 48 << 20))

    # ---- stage 2: recurrence, streamed over (batch-parallel, time) grid -----
    h = pl.pallas_call(
        gru_recurrent_kernel,
        out_shape=jax.ShapeDtypeStruct((Bp, Hp), jnp.float32),
        grid_spec=pltpu.PrefetchScalarGridSpec(
            num_scalar_prefetch=0,
            grid=(nb, nt),
            in_specs=[
                pl.BlockSpec((Tc, Bb, 3 * Hp), lambda b, t: (t, b, 0)),
                pl.BlockSpec((Bb, 1), lambda b, t: (b, 0)),
                pl.BlockSpec((Hp, 3 * Hp), lambda b, t: (0, 0)),
                pl.BlockSpec((1, Hp), lambda b, t: (0, 0)),
            ],
            out_specs=pl.BlockSpec((Bb, Hp), lambda b, t: (b, 0)),
        ),
        compiler_params=pltpu.CompilerParams(
            dimension_semantics=("parallel", "arbitrary"),
            vmem_limit_bytes=vmem_limit),
    )(gi, lens, w_h, b_hn)

    return h[:B, :H]


# ---------------------------------------------------------------------------
# Synthetic parameters + pure-JAX reference (for correctness check)
# ---------------------------------------------------------------------------
def init_params(key, vocab_size, embed_dim=300, hidden=100):
    """Deterministic synthetic parameters matching the module's shapes."""
    k_emb, k_ih, k_hh, k_bih, k_bhh = jax.random.split(key, 5)
    # TODO(synk): GloVe file loading and spaCy tokenization (init_embeddings /
    # prepare_batch) are host-side preprocessing; replaced by synthetic values.
    embed = jax.random.normal(k_emb, (vocab_size, embed_dim), jnp.float32)
    embed = embed.at[0].set(0.0)   # nn.Embedding(padding_idx=0)

    bound = 1.0 / jnp.sqrt(jnp.float32(hidden))
    w_ih = jax.random.uniform(k_ih, (3 * hidden, embed_dim), jnp.float32, -bound, bound)
    w_hh = jax.random.uniform(k_hh, (3 * hidden, hidden), jnp.float32, -bound, bound)
    b_ih = jax.random.uniform(k_bih, (3 * hidden,), jnp.float32, -bound, bound)
    b_hh = jax.random.uniform(k_bhh, (3 * hidden,), jnp.float32, -bound, bound)

    def split3(w):
        return w[0:hidden], w[hidden:2 * hidden], w[2 * hidden:3 * hidden]

    w_ir, w_iz, w_in = (w.T for w in split3(w_ih))
    w_hr, w_hz, w_hn = (w.T for w in split3(w_hh))
    b_ir, b_iz, b_in = (b.reshape(1, hidden) for b in split3(b_ih))
    b_hr, b_hz, b_hn = (b.reshape(1, hidden) for b in split3(b_hh))

    return dict(embedding=embed,
                w_ir=w_ir, w_iz=w_iz, w_in=w_in,
                w_hr=w_hr, w_hz=w_hz, w_hn=w_hn,
                b_ir=b_ir, b_iz=b_iz, b_in=b_in,
                b_hr=b_hr, b_hz=b_hz, b_hn=b_hn)


def gru_reference(batch_ids, doc_len, params):
    """Pure-JAX (f32) reference of the same masked GRU."""
    emb = params["embedding"][batch_ids].astype(jnp.float32)  # (B, T, E)
    B, T, _ = emb.shape
    H = params["w_hr"].shape[0]
    mask = (jnp.arange(T)[None, :] < doc_len[:, None]).astype(jnp.float32)

    def step(h, inp):
        x_t, m = inp
        r = jax.nn.sigmoid(x_t @ params["w_ir"] + params["b_ir"]
                           + h @ params["w_hr"] + params["b_hr"])
        z = jax.nn.sigmoid(x_t @ params["w_iz"] + params["b_iz"]
                           + h @ params["w_hz"] + params["b_hz"])
        n = jnp.tanh(x_t @ params["w_in"] + params["b_in"]
                     + r * (h @ params["w_hn"] + params["b_hn"]))
        h_new = (1.0 - z) * n + z * h
        return m * h_new + (1.0 - m) * h, None

    xs = (jnp.transpose(emb, (1, 0, 2)), jnp.transpose(mask)[..., None])
    h0 = jnp.zeros((B, H), jnp.float32)
    h_final, _ = lax.scan(step, h0, xs)
    return h_final


if __name__ == "__main__":
    key = jax.random.PRNGKey(0)
    vocab, E, H = 32, 300, 100        # module hardcodes E=300, hidden default 100
    B, T = 4, 8

    k_params, k_ids = jax.random.split(key)
    params = init_params(k_params, vocab, E, H)

    doc_len = jnp.array([8, 3, 5, 1], dtype=jnp.int32)
    ids = jax.random.randint(k_ids, (B, T), 1, vocab, dtype=jnp.int32)
    pad_mask = jnp.arange(T)[None, :] < doc_len[:, None]
    ids = jnp.where(pad_mask, ids, 0)  # mirrors prepare_batch zero-padding

    h = gru_encoder_forward(ids, doc_len, params)
    h = jax.block_until_ready(h)

    h_ref = gru_reference(ids, doc_len, params)
    assert h.shape == (B, H)
    # Tolerance reflects bf16 storage of gi / W_h / emb (f32 accumulation and
    # f32 gate math); a structural bug produces errors orders of magnitude larger.
    assert jnp.allclose(h, h_ref, atol=2e-2, rtol=2e-2), "kernel mismatch vs JAX reference"

    print("KERNEL_OK")
</pallas_src>

<mosaic_0001>
module attributes {stable_mosaic.version = 11 : i64} {
  func.func @_input_proj_kernel(%arg0: i32, %arg1: memref<64x384xbf16, #tpu.memory_space<vmem>>, %arg2: memref<384x384xbf16, #tpu.memory_space<vmem>>, %arg3: memref<1x384xf32, #tpu.memory_space<vmem>>, %arg4: memref<64x384xbf16, #tpu.memory_space<vmem>>) attributes {dimension_semantics = [#tpu.dimension_semantics<parallel>], iteration_bounds = array<i64: 1>, scalar_prefetch = 0 : i64, scratch_operands = 0 : i64, tpu.core_type = #tpu.core_type<tc>, window_params = [{transform_indices = @transform_0, window_bounds = array<i64: 64, 384>}, {pipeline_mode = #tpu.pipeline_mode<synchronous>, transform_indices = @transform_1, window_bounds = array<i64: 384, 384>}, {pipeline_mode = #tpu.pipeline_mode<synchronous>, transform_indices = @transform_2, window_bounds = array<i64: 1, 384>}, {transform_indices = @transform_3, window_bounds = array<i64: 64, 384>}]} {
    %c0 = arith.constant 0 : index
    %c0_0 = arith.constant 0 : index
    %0 = vector.load %arg1[%c0, %c0_0] : memref<64x384xbf16, #tpu.memory_space<vmem>>, vector<64x384xbf16>
    %c0_1 = arith.constant 0 : index
    %c0_2 = arith.constant 0 : index
    %1 = vector.load %arg2[%c0_1, %c0_2] : memref<384x384xbf16, #tpu.memory_space<vmem>>, vector<384x384xbf16>
    %cst = arith.constant dense<0.000000e+00> : vector<64x384xf32>
    %2 = tpu.matmul %0, %1, %cst {dimension_numbers = #tpu.dot_dimension_numbers<[1], [0], [0], [1], [0, 0, 1, 1], [], []>} : vector<64x384xbf16>, vector<384x384xbf16>, vector<64x384xf32> -> vector<64x384xf32>
    %c0_3 = arith.constant 0 : index
    %c0_4 = arith.constant 0 : index
    %3 = vector.load %arg3[%c0_3, %c0_4] : memref<1x384xf32, #tpu.memory_space<vmem>>, vector<1x384xf32>
    %4 = vector.broadcast %3 : vector<1x384xf32> to vector<64x384xf32>
    %5 = arith.addf %2, %4 : vector<64x384xf32>
    %6 = arith.truncf %5 : vector<64x384xf32> to vector<64x384xbf16>
    %c0_5 = arith.constant 0 : index
    %c0_6 = arith.constant 0 : index
    %7 = vector.load %arg4[%c0_5, %c0_6] : memref<64x384xbf16, #tpu.memory_space<vmem>>, vector<64x384xbf16>
    tpu.vector_store %arg4[%c0_5, %c0_6], %6 {strides = array<i32>} : memref<64x384xbf16, #tpu.memory_space<vmem>>, vector<64x384xbf16>,
    return
  }
  func.func @transform_0(%arg0: i32) -> (i32, i32) {
    %c0_i32 = arith.constant 0 : i32
    %c0_i32_0 = arith.constant 0 : i32
    return %arg0, %c0_i32 : i32, i32
  }
  func.func @transform_1(%arg0: i32) -> (i32, i32) {
    %c0_i32 = arith.constant 0 : i32
    %c0_i32_0 = arith.constant 0 : i32
    %c0_i32_1 = arith.constant 0 : i32
    return %c0_i32, %c0_i32_0 : i32, i32
  }
  func.func @transform_2(%arg0: i32) -> (i32, i32) {
    %c0_i32 = arith.constant 0 : i32
    %c0_i32_0 = arith.constant 0 : i32
    %c0_i32_1 = arith.constant 0 : i32
    return %c0_i32, %c0_i32_0 : i32, i32
  }
  func.func @transform_3(%arg0: i32) -> (i32, i32) {
    %c0_i32 = arith.constant 0 : i32
    %c0_i32_0 = arith.constant 0 : i32
    return %arg0, %c0_i32 : i32, i32
  }
}

</mosaic_0001>

<bundles_post_ra>
// kernel: tpu_custom_call.1
= control target key start
LH: loop header
LB: loop body
LE: loop exit
PB: predicated region body
PF: predicated region fallthrough
CT: control target
= control target key end

     0   :  { %8 = vsyncpa [#allocation3], 0  ;;  %s1666_s0 = inlined_call_operand.hbm [shape: bf16[64,384], index: 0, kind: input, shape index: {}]   ;;  %s1667_s1 = inlined_call_operand.hbm [shape: bf16[384,384], index: 1, kind: input, shape index: {}]   ;;  %s1668_s2 = inlined_call_operand.hbm [shape: f32[1,384], index: 2, kind: input, shape index: {}]   ;;  %s1669_s3 = inlined_call_operand.hbm [shape: bf16[64,384], index: 3, kind: output, shape index: {}]  }
   0x1   :  { %9 = vsyncpa [#allocation6], 0 }
   0x2   :  { %10 = vsyncpa [#allocation4], 0  ;;  %s28_s14 = sshll.u32 %s1667_s1, 4  ;;  %s1485_s15 = smov [#allocation5]   ;;  %s29_s14 = int_to_ptr.hbm [resolvable:$true] %s28_s14 }
   0x3   :  { %s30_s16 = sshll.u32 %s1485_s15, 4  ;;  %s15_s19 = sshll.u32 %s1666_s0, 4  ;;  %s31_s16 = int_to_ptr.vmem [resolvable:$true] %s30_s16  ;;  %s16_s19 = int_to_ptr.hbm [resolvable:$true] %s15_s19 }
   0x4   :  { %s1486_s20 = smov 192   ;;  %s1487_s21 = smov 12  }
   0x5   :  { %36 = dma.hbm_to_vmem [thread:$0]  %s29_s14, 9216, %s31_s16, [#allocation6], %s1486_s20, %s1486_s20, %s1487_s21  }
   0x6   :  { %s1488_s22 = smov [#allocation2]   ;;  %s42_s1 = sshll.u32 %s1668_s2, 4  ;;  %s43_s1 = int_to_ptr.hbm [resolvable:$true] %s42_s1 }
   0x7   :  { %s17_s23 = sshll.u32 %s1488_s22, 4  ;;  %s1489_s0 = smov [#allocation7]   ;;  %s18_s23 = int_to_ptr.vmem [resolvable:$true] %s17_s23 }
   0x8   :  { %23 = dma.hbm_to_vmem [thread:$0]  %s16_s19, 1536, %s18_s23, [#allocation3], %s1486_s20, %s1486_s20, %s1487_s21  }
   0x9   :  { %s44_s26 = sshll.u32 %s1489_s0, 4  ;;  %s45_s26 = int_to_ptr.vmem [resolvable:$true] %s44_s26 }
   0xa   :  { %47 = dma.hbm_to_vmem [thread:$0]  %s43_s1, 48, %s45_s26, [#allocation6]  }
   0xb   :  { %1479 = dma.done.wait [#allocation3], 1536  }
   0xc   :  { %1480 = vsyncadd [#allocation3], 4294965760 }
   0xd   :  { %1481 = dma.done.wait [#allocation6], 9264  }
   0xe   :  { %1482 = vsyncadd [#allocation6], 4294958032  ;;  %v1075_v0 = vld [vmem:[#allocation5 + $0xa8] sm:$0xf]  ;;  %v1311_v1 = vld [vmem:[#allocation5 + $0xb0] sm:$0xf0] }
   0xf   :  { %v1267_v2 = vld [vmem:[#allocation5 + $0x228] sm:$0xf]  ;;  %v1076_v3 = vor.u32 %v1311_v1, %v1075_v0  ;;  %v1359_v4 = vld [vmem:[#allocation5 + $0x230] sm:$0xf0]  ;;  %v1063_v5 = vld [vmem:[#allocation5 + $0x90] sm:$0xf] }
  0x10   :  { %v1308_v6 = vld [vmem:[#allocation5 + $0x98] sm:$0xf0]  ;;  %v1268_v7 = vor.u32 %v1359_v4, %v1267_v2  ;;  %v1255_v8 = vld [vmem:[#allocation5 + $0x210] sm:$0xf]  ;;  %v1310_v10 = vld [vmem:[#allocation5 + $0xac] sm:$0xf] }
  0x11   :  { %v1356_v9 = vld [vmem:[#allocation5 + $0x218] sm:$0xf0]  ;;  %628 = vmatpush.bf16.msra.mxu0 %v1076_v3  ;;  %1361 = vmatpush.bf16.msra.mxu1 %v1076_v3  ;;  %v1064_v11 = vor.u32 %v1308_v6, %v1063_v5  ;;  %v1077_v12 = vld [vmem:[#allocation5 + $0xb4] sm:$0xf0]  ;;  %v1305_v16 = vld [vmem:[#allocation5 + $0x80] sm:$0xf0] }
  0x12   :  { %686 = vmatpush.bf16.msra.mxu2 %v1268_v7  ;;  %v1256_v13 = vor.u32 %v1356_v9, %v1255_v8  ;;  %v1080_v14 = vor.u32 %v1310_v10, %v1077_v12  ;;  %v1051_v15 = vld [vmem:[#allocation5 + $0x78] sm:$0xf]  ;;  %v1307_v17 = vld [vmem:[#allocation5 + $0x94] sm:$0xf]  ;;  %v1353_v19 = vld [vmem:[#allocation5 + $0x200] sm:$0xf0] }
  0x13   :  { %v1243_v18 = vld [vmem:[#allocation5 + $0x1f8] sm:$0xf]  ;;  %v1065_v20 = vld [vmem:[#allocation5 + $0x9c] sm:$0xf0]  ;;  %v1052_v22 = vor.u32 %v1305_v16, %v1051_v15  ;;  %v1304_v23 = vld [vmem:[#allocation5 + $0x7c] sm:$0xf] }
  0x14   :  { %715 = vmatpush.bf16.msra.mxu3 %v1080_v14  ;;  %v1068_v21 = vor.u32 %v1307_v17, %v1065_v20  ;;  %v1053_v24 = vld [vmem:[#allocation5 + $0x84] sm:$0xf0]  ;;  %v1244_v25 = vor.u32 %v1353_v19, %v1243_v18  ;;  %v1039_v26 = vld [vmem:[#allocation5 + $0x60] sm:$0xf]  ;;  %v1302_v27 = vld [vmem:[#allocation5 + $0x68] sm:$0xf0] }
  0x15   :  { %629 = vmatpush.bf16.msra.mxu0 %v1064_v11  ;;  %1362 = vmatpush.bf16.msra.mxu1 %v1064_v11  ;;  %v1231_v28 = vld [vmem:[#allocation5 + $0x1e0] sm:$0xf]  ;;  %v1350_v29 = vld [vmem:[#allocation5 + $0x1e8] sm:$0xf0]  ;;  %v1056_v30 = vor.u32 %v1304_v23, %v1053_v24  ;;  %v1040_v31 = vor.u32 %v1302_v27, %v1039_v26  ;;  %v1301_v32 = vld [vmem:[#allocation5 + $0x64] sm:$0xf] }
  0x16   :  { %687 = vmatpush.bf16.msra.mxu2 %v1256_v13  ;;  %v1041_v33 = vld [vmem:[#allocation5 + $0x6c] sm:$0xf0]  ;;  %v1232_v34 = vor.u32 %v1350_v29, %v1231_v28  ;;  %v1027_v35 = vld [vmem:[#allocation5 + $0x48] sm:$0xf]  ;;  %v1299_v36 = vld [vmem:[#allocation5 + $0x50] sm:$0xf0] }
  0x17   :  { %v1219_v37 = vld [vmem:[#allocation5 + $0x1c8] sm:$0xf]  ;;  %v1347_v38 = vld [vmem:[#allocation5 + $0x1d0] sm:$0xf0]  ;;  %v1044_v39 = vor.u32 %v1301_v32, %v1041_v33  ;;  %v1028_v40 = vor.u32 %v1299_v36, %v1027_v35  ;;  %v1298_v41 = vld [vmem:[#allocation5 + $0x4c] sm:$0xf] }
  0x18   :  { %716 = vmatpush.bf16.msra.mxu3 %v1068_v21  ;;  %v1029_v42 = vld [vmem:[#allocation5 + $0x54] sm:$0xf0]  ;;  %v1220_v43 = vor.u32 %v1347_v38, %v1219_v37  ;;  %v1015_v44 = vld [vmem:[#allocation5 + $0x30] sm:$0xf]  ;;  %v1296_v45 = vld [vmem:[#allocation5 + $0x38] sm:$0xf0] }
  0x19   :  { %630 = vmatpush.bf16.msra.mxu0 %v1052_v22  ;;  %1363 = vmatpush.bf16.msra.mxu1 %v1052_v22  ;;  %v1207_v46 = vld [vmem:[#allocation5 + $0x1b0] sm:$0xf]  ;;  %v1344_v47 = vld [vmem:[#allocation5 + $0x1b8] sm:$0xf0]  ;;  %v1032_v48 = vor.u32 %v1298_v41, %v1029_v42  ;;  %v1016_v49 = vor.u32 %v1296_v45, %v1015_v44  ;;  %v1295_v50 = vld [vmem:[#allocation5 + $0x34] sm:$0xf] }
  0x1a   :  { %688 = vmatpush.bf16.msra.mxu2 %v1244_v25  ;;  %v1017_v51 = vld [vmem:[#allocation5 + $0x3c] sm:$0xf0]  ;;  %v1208_v52 = vor.u32 %v1344_v47, %v1207_v46  ;;  %v1003_v53 = vld [vmem:[#allocation5 + $0x18] sm:$0xf]  ;;  %v1293_v54 = vld [vmem:[#allocation5 + $0x20] sm:$0xf0] }
  0x1b   :  { %v1195_v55 = vld [vmem:[#allocation5 + $0x198] sm:$0xf]  ;;  %v1341_v56 = vld [vmem:[#allocation5 + $0x1a0] sm:$0xf0]  ;;  %v1020_v57 = vor.u32 %v1295_v50, %v1017_v51  ;;  %v1004_v58 = vor.u32 %v1293_v54, %v1003_v53  ;;  %v991_v59 = vld [vmem:[#allocation5] sm:$0xf] }
  0x1c   :  { %717 = vmatpush.bf16.msra.mxu3 %v1056_v30  ;;  %v1292_v60 = vld [vmem:[#allocation5 + $0x1c] sm:$0xf]  ;;  %v1005_v61 = vld [vmem:[#allocation5 + $0x24] sm:$0xf0]  ;;  %v1196_v62 = vor.u32 %v1341_v56, %v1195_v55  ;;  %v1290_v63 = vld [vmem:[#allocation5 + $0x8] sm:$0xf0] }
  0x1d   :  { %631 = vmatpush.bf16.msra.mxu0 %v1040_v31  ;;  %1364 = vmatpush.bf16.msra.mxu1 %v1040_v31  ;;  %v1183_v0 = vld [vmem:[#allocation5 + $0x180] sm:$0xf]  ;;  %v1338_v1 = vld [vmem:[#allocation5 + $0x188] sm:$0xf0]  ;;  %v967_v4 = vld [vmem:[#allocation2 + $0x30] sm:$0xf]  ;;  %v1008_v9 = vor.u32 %v1292_v60, %v1005_v61  ;;  %v992_v13 = vor.u32 %v1290_v63, %v991_v59 }
  0x1e   :  { %689 = vmatpush.bf16.msra.mxu2 %v1232_v34  ;;  %v943_v2 = vld [vmem:[#allocation2] sm:$0xf]  ;;  %v1278_v3 = vld [vmem:[#allocation2 + $0x8] sm:$0xf0]  ;;  %v1284_v5 = vld [vmem:[#allocation2 + $0x38] sm:$0xf0]  ;;  %v1184_v17 = vor.u32 %v1338_v1, %v1183_v0 }
  0x1f   :  { %v1171_v6 = vld [vmem:[#allocation5 + $0x168] sm:$0xf]  ;;  %v1335_v7 = vld [vmem:[#allocation5 + $0x170] sm:$0xf0]  ;;  %v1334_v8 = vld [vmem:[#allocation5 + $0x16c] sm:$0xf]  ;;  %v1526_v27 = vor.u32 %v1278_v3, %v943_v2  ;;  %v1528_v28 = vor.u32 %v1284_v5, %v967_v4 }
  0x20   :  { %718 = vmatpush.bf16.msra.mxu3 %v1044_v39  ;;  %v1173_v10 = vld [vmem:[#allocation5 + $0x174] sm:$0xf0]  ;;  %v1083_v11 = vld [vmem:[#allocation5 + $0xb0] sm:$0xf]  ;;  %v1312_v12 = vld [vmem:[#allocation5 + $0xb8] sm:$0xf0]  ;;  %v1172_v18 = vor.u32 %v1335_v7, %v1171_v6 }
  0x21   :  { %632 = vmatpush.bf16.msra.mxu0 %v1028_v40  ;;  %1365 = vmatpush.bf16.msra.mxu1 %v1028_v40  ;;  %v951_v14 = vld [vmem:[#allocation2 + $0x8] sm:$0xf]  ;;  %v1279_v15 = vld [vmem:[#allocation2 + $0x10] sm:$0xf0]  ;;  %v1289_v16 = vld [vmem:[#allocation5 + $0x4] sm:$0xf]  ;;  %v1176_v22 = vor.u32 %v1334_v8, %v1173_v10  ;;  %v1084_v25 = vor.u32 %v1312_v12, %v1083_v11 }
  0x22   :  { %690 = vmatpush.bf16.msra.mxu2 %v1220_v43  ;;  %v993_v19 = vld [vmem:[#allocation5 + $0xc] sm:$0xf0]  ;;  %v1332_v21 = vld [vmem:[#allocation5 + $0x158] sm:$0xf0]  ;;  %v1331_v23 = vld [vmem:[#allocation5 + $0x154] sm:$0xf]  ;;  %v1530_v32 = vor.u32 %v1279_v15, %v951_v14 }
  0x23   :  { %v1159_v20 = vld [vmem:[#allocation5 + $0x150] sm:$0xf]  ;;  %v1161_v24 = vld [vmem:[#allocation5 + $0x15c] sm:$0xf0]  ;;  %v1071_v26 = vld [vmem:[#allocation5 + $0x98] sm:$0xf]  ;;  %v996_v33 = vor.u32 %v1289_v16, %v993_v19 }
  0x24   :  { %719 = vmatpush.bf16.msra.mxu3 %v1032_v48  ;;  %v1309_v29 = vld [vmem:[#allocation5 + $0xa0] sm:$0xf0]  ;;  %v1179_v30 = vld [vmem:[#allocation5 + $0x170] sm:$0xf]  ;;  %v1336_v31 = vld [vmem:[#allocation5 + $0x178] sm:$0xf0]  ;;  %v1160_v34 = vor.u32 %v1332_v21, %v1159_v20  ;;  %v1164_v36 = vor.u32 %v1331_v23, %v1161_v24 }
  0x25   :  { %633 = vmatpush.bf16.msra.mxu0 %v1016_v49  ;;  %1366 = vmatpush.bf16.msra.mxu1 %v1016_v49  ;;  %v1180_v35 = vor.u32 %v1336_v31, %v1179_v30  ;;  %v1147_v37 = vld [vmem:[#allocation5 + $0x138] sm:$0xf]  ;;  %v1329_v38 = vld [vmem:[#allocation5 + $0x140] sm:$0xf0]  ;;  %v1328_v39 = vld [vmem:[#allocation5 + $0x13c] sm:$0xf]  ;;  %v1072_v40 = vor.u32 %v1309_v29, %v1071_v26 }
  0x26   :  { %691 = vmatpush.bf16.msra.mxu2 %v1208_v52  ;;  %v1149_v41 = vld [vmem:[#allocation5 + $0x144] sm:$0xf0]  ;;  %v1059_v42 = vld [vmem:[#allocation5 + $0x80] sm:$0xf]  ;;  %v1306_v43 = vld [vmem:[#allocation5 + $0x88] sm:$0xf0]  ;;  %v1148_v45 = vor.u32 %v1329_v38, %v1147_v37 }
  0x27   :  { %v1167_v44 = vld [vmem:[#allocation5 + $0x158] sm:$0xf]  ;;  %v1135_v46 = vld [vmem:[#allocation5 + $0x120] sm:$0xf]  ;;  %v1333_v47 = vld [vmem:[#allocation5 + $0x160] sm:$0xf0]  ;;  %v1152_v48 = vor.u32 %v1328_v39, %v1149_v41  ;;  %v1060_v52 = vor.u32 %v1306_v43, %v1059_v42 }
  0x28   :  { %720 = vmatpush.bf16.msra.mxu3 %v1020_v57  ;;  %v1326_v49 = vld [vmem:[#allocation5 + $0x128] sm:$0xf0]  ;;  %v1325_v50 = vld [vmem:[#allocation5 + $0x124] sm:$0xf]  ;;  %v1137_v51 = vld [vmem:[#allocation5 + $0x12c] sm:$0xf0]  ;;  %v1168_v53 = vor.u32 %v1333_v47, %v1167_v44 }
  0x29   :  { %634 = vmatpush.bf16.msra.mxu0 %v1004_v58  ;;  %1367 = vmatpush.bf16.msra.mxu1 %v1004_v58  ;;  %v1047_v54 = vld [vmem:[#allocation5 + $0x68] sm:$0xf]  ;;  %v1303_v55 = vld [vmem:[#allocation5 + $0x70] sm:$0xf0]  ;;  %v1155_v56 = vld [vmem:[#allocation5 + $0x140] sm:$0xf]  ;;  %v1136_v58 = vor.u32 %v1326_v49, %v1135_v46  ;;  %v1140_v60 = vor.u32 %v1325_v50, %v1137_v51 }
  0x2a   :  { %692 = vmatpush.bf16.msra.mxu2 %v1196_v62  ;;  %v1330_v57 = vld [vmem:[#allocation5 + $0x148] sm:$0xf0]  ;;  %v955_v61 = vld [vmem:[#allocation2 + $0x18] sm:$0xf]  ;;  %v1123_v62 = vld [vmem:[#allocation5 + $0x108] sm:$0xf]  ;;  %v1048_v1 = vor.u32 %v1303_v55, %v1047_v54 }
  0x2b   :  { %v1156_v59 = vor.u32 %v1330_v57, %v1155_v56  ;;  %v1323_v63 = vld [vmem:[#allocation5 + $0x110] sm:$0xf0]  ;;  %v1322_v0 = vld [vmem:[#allocation5 + $0x10c] sm:$0xf]  ;;  %v1125_v2 = vld [vmem:[#allocation5 + $0x114] sm:$0xf0] }
  0x2c   :  { %721 = vmatpush.bf16.msra.mxu3 %v1008_v9  ;;  %v1035_v3 = vld [vmem:[#allocation5 + $0x50] sm:$0xf]  ;;  %v1300_v4 = vld [vmem:[#allocation5 + $0x58] sm:$0xf0]  ;;  %v1281_v5 = vld [vmem:[#allocation2 + $0x20] sm:$0xf0]  ;;  %v1124_v8 = vor.u32 %v1323_v63, %v1123_v62  ;;  %v1128_v11 = vor.u32 %v1322_v0, %v1125_v2 }
  0x2d   :  { %635 = vmatpush.bf16.msra.mxu0 %v992_v13  ;;  %1368 = vmatpush.bf16.msra.mxu1 %v992_v13  ;;  %v979_v6 = vld [vmem:[#allocation2 + $0x48] sm:$0xf]  ;;  %v1287_v7 = vld [vmem:[#allocation2 + $0x50] sm:$0xf0]  ;;  %v963_v9 = vld [vmem:[#allocation2 + $0x20] sm:$0xf]  ;;  %v1036_v14 = vor.u32 %v1300_v4, %v1035_v3  ;;  %v1536_v15 = vor.u32 %v1281_v5, %v955_v61 }
  0x2e   :  { %693 = vmatpush.bf16.msra.mxu2 %v1184_v17  ;;  %v1282_v10 = vld [vmem:[#allocation2 + $0x28] sm:$0xf0]  ;;  %v1111_v12 = vld [vmem:[#allocation5 + $0xf0] sm:$0xf]  ;;  %v1320_v13 = vld [vmem:[#allocation5 + $0xf8] sm:$0xf0]  ;;  %v1538_v16 = vor.u32 %v1287_v7, %v979_v6 }
  0x2f   :  { %v1319_v17 = vld [vmem:[#allocation5 + $0xf4] sm:$0xf]  ;;  %v1540_v19 = vor.u32 %v1282_v10, %v963_v9  ;;  %v1112_v20 = vor.u32 %v1320_v13, %v1111_v12  ;;  %v1099_v21 = vld [vmem:[#allocation5 + $0xd8] sm:$0xf]  ;;  %v1317_v23 = vld [vmem:[#allocation5 + $0xe0] sm:$0xf0] }
  0x30   :  { %636 = vmatmul.bf16.vlgmr.msra.gmra.mxu0 %v1526_v27  ;;  %646 = vmatmul.bf16.vlgmr.msra.gmra.mxu1 %v1528_v28  ;;  %v1143_v24 = vld [vmem:[#allocation5 + $0x128] sm:$0xf]  ;;  %v1316_v26 = vld [vmem:[#allocation5 + $0xdc] sm:$0xf]  ;;  %v1087_v31 = vld [vmem:[#allocation5 + $0xc0] sm:$0xf] }
  0x31   :  { %657 = vmatpush.bf16.msrb.mxu1 %v1172_v18  ;;  %744 = vmatpush.bf16.msrb.mxu0 %v1176_v22  ;;  %v1113_v18 = vld [vmem:[#allocation5 + $0xfc] sm:$0xf0]  ;;  %v1101_v29 = vld [vmem:[#allocation5 + $0xe4] sm:$0xf0]  ;;  %v1297_v37 = vld [vmem:[#allocation5 + $0x40] sm:$0xf0] }
  0x32   :  { %802 = vmatpush.bf16.msrb.mxu2 %v1084_v25  ;;  %722 = vmatpush.bf16.msra.mxu3 %v996_v33  ;;  %v1116_v22 = vor.u32 %v1319_v17, %v1113_v18  ;;  %v1327_v25 = vld [vmem:[#allocation5 + $0x130] sm:$0xf0]  ;;  %v1314_v33 = vld [vmem:[#allocation5 + $0xc8] sm:$0xf0]  ;;  %v1104_v38 = vor.u32 %v1316_v26, %v1101_v29  ;;  %v1089_v39 = vld [vmem:[#allocation5 + $0xcc] sm:$0xf0] }
  0x33   :  { %694 = vmatmul.bf16.vlgmr.msra.gmra.mxu2 %v1530_v32  ;;  %v1144_v30 = vor.u32 %v1327_v25, %v1143_v24  ;;  %v1131_v41 = vld [vmem:[#allocation5 + $0x110] sm:$0xf]  ;;  %v1324_v42 = vld [vmem:[#allocation5 + $0x118] sm:$0xf0]  ;;  %v1358_v43 = vld [vmem:[#allocation5 + $0x22c] sm:$0xf]  ;;  %v1088_v50 = vor.u32 %v1314_v33, %v1087_v31 }
  0x34   :  { %v1269_v44 = vld [vmem:[#allocation5 + $0x234] sm:$0xf0]  ;;  %v1132_v46 = vor.u32 %v1324_v42, %v1131_v41  ;;  %v1360_v47 = vld [vmem:[#allocation5 + $0x238] sm:$0xf0]  ;;  %v1294_v49 = vld [vmem:[#allocation5 + $0x28] sm:$0xf0] }
  0x35   :  { %658 = vmatpush.bf16.msrb.mxu1 %v1160_v34  ;;  %745 = vmatpush.bf16.msrb.mxu0 %v1164_v36  ;;  %v1100_v34 = vor.u32 %v1317_v23, %v1099_v21  ;;  %v1023_v36 = vld [vmem:[#allocation5 + $0x38] sm:$0xf]  ;;  %v999_v54 = vld [vmem:[#allocation5 + $0x8] sm:$0xf]  ;;  %v1272_v56 = vor.u32 %v1358_v43, %v1269_v44  ;;  %v1355_v61 = vld [vmem:[#allocation5 + $0x214] sm:$0xf] }
  0x36   :  { %831 = vmatpush.bf16.msrb.mxu3 %v1180_v35  ;;  %803 = vmatpush.bf16.msrb.mxu2 %v1072_v40  ;;  %v1313_v35 = vld [vmem:[#allocation5 + $0xc4] sm:$0xf]  ;;  %v1024_v40 = vor.u32 %v1297_v37, %v1023_v36  ;;  %v1257_v62 = vld [vmem:[#allocation5 + $0x21c] sm:$0xf0]  ;;  %v975_v2 = vld [vmem:[#allocation2 + $0x38] sm:$0xf] }
  0x37   :  { %723 = vmatmul.bf16.vlgmr.msra.gmra.mxu3 %v1526_v27  ;;  %v1092_v55 = vor.u32 %v1313_v35, %v1089_v39  ;;  %v1277_v0 = vld [vmem:[#allocation2 + $0x4] sm:$0xf]  ;;  %v1263_v5 = vld [vmem:[#allocation5 + $0x218] sm:$0xf]  ;;  %v1352_v10 = vld [vmem:[#allocation5 + $0x1fc] sm:$0xf] }
  0x38   :  { %v1285_v4 = vld [vmem:[#allocation2 + $0x40] sm:$0xf0]  ;;  %v1095_v17 = vld [vmem:[#allocation5 + $0xc8] sm:$0xf]  ;;  %v1315_v18 = vld [vmem:[#allocation5 + $0xd0] sm:$0xf0] }
  0x39   :  { %659 = vmatpush.bf16.msrb.mxu1 %v1148_v45  ;;  %746 = vmatpush.bf16.msrb.mxu0 %v1152_v48  ;;  %v1275_v45 = vld [vmem:[#allocation5 + $0x230] sm:$0xf]  ;;  %v1011_v48 = vld [vmem:[#allocation5 + $0x20] sm:$0xf]  ;;  %v1357_v6 = vld [vmem:[#allocation5 + $0x220] sm:$0xf0]  ;;  %v1548_v12 = vor.u32 %v1285_v4, %v975_v2 }
  0x3a   :  { %832 = vmatpush.bf16.msrb.mxu3 %v1168_v53  ;;  %804 = vmatpush.bf16.msrb.mxu2 %v1060_v52  ;;  %v1012_v51 = vor.u32 %v1294_v49, %v1011_v48  ;;  %v1119_v52 = vld [vmem:[#allocation5 + $0xf8] sm:$0xf]  ;;  %v1321_v53 = vld [vmem:[#allocation5 + $0x100] sm:$0xf0]  ;;  %v1276_v63 = vor.u32 %v1360_v47, %v1275_v45  ;;  %v1264_v13 = vor.u32 %v1357_v6, %v1263_v5  ;;  %v1233_v21 = vld [vmem:[#allocation5 + $0x1ec] sm:$0xf0] }
  0x3b   :  { %v1120_v57 = vor.u32 %v1321_v53, %v1119_v52  ;;  %v1251_v23 = vld [vmem:[#allocation5 + $0x200] sm:$0xf]  ;;  %v1354_v24 = vld [vmem:[#allocation5 + $0x208] sm:$0xf0]  ;;  %v1239_v31 = vld [vmem:[#allocation5 + $0x1e8] sm:$0xf] }
  0x3c   :  { %v1252_v25 = vor.u32 %v1354_v24, %v1251_v23  ;;  %v1346_v29 = vld [vmem:[#allocation5 + $0x1cc] sm:$0xf]  ;;  %v1351_v33 = vld [vmem:[#allocation5 + $0x1f0] sm:$0xf0]  ;;  %v1209_v37 = vld [vmem:[#allocation5 + $0x1bc] sm:$0xf0] }
  0x3d   :  { %660 = vmatpush.bf16.msrb.mxu1 %v1136_v58  ;;  %747 = vmatpush.bf16.msrb.mxu0 %v1140_v60  ;;  %v1291_v58 = vld [vmem:[#allocation5 + $0x10] sm:$0xf0]  ;;  %v1318_v60 = vld [vmem:[#allocation5 + $0xe8] sm:$0xf0]  ;;  %v957_v39 = vld [vmem:[#allocation2 + $0x24] sm:$0xf0] }
  0x3e   :  { %833 = vmatpush.bf16.msrb.mxu3 %v1156_v59  ;;  %805 = vmatpush.bf16.msrb.mxu2 %v1048_v1  ;;  %v1107_v59 = vld [vmem:[#allocation5 + $0xe0] sm:$0xf]  ;;  %v945_v1 = vld [vmem:[#allocation2 + $0xc] sm:$0xf0]  ;;  %v1000_v3 = vor.u32 %v1291_v58, %v999_v54  ;;  %v1343_v36 = vld [vmem:[#allocation5 + $0x1b4] sm:$0xf] }
  0x3f   :  { %v1108_v7 = vor.u32 %v1318_v60, %v1107_v59  ;;  %v1546_v9 = vor.u32 %v1277_v0, %v945_v1  ;;  %v1288_v41 = vld [vmem:[#allocation2 + $0x58] sm:$0xf0]  ;;  %v1212_v42 = vor.u32 %v1343_v36, %v1209_v37  ;;  %v1227_v45 = vld [vmem:[#allocation5 + $0x1d0] sm:$0xf]  ;;  %v1197_v48 = vld [vmem:[#allocation5 + $0x1a4] sm:$0xf0] }
  0x40   :  { %641 = vmatmul.bf16.gmra.mxu0 %v1536_v15  ;;  %651 = vmatmul.bf16.gmra.mxu1 %v1538_v16  ;;  %v1340_v47 = vld [vmem:[#allocation5 + $0x19c] sm:$0xf]  ;;  %v1345_v52 = vld [vmem:[#allocation5 + $0x1c0] sm:$0xf0]  ;;  %v1342_v58 = vld [vmem:[#allocation5 + $0x1a8] sm:$0xf0] }
  0x41   :  { %661 = vmatpush.bf16.msrb.mxu1 %v1124_v8  ;;  %748 = vmatpush.bf16.msrb.mxu0 %v1128_v11  ;;  %v1260_v8 = vor.u32 %v1355_v61, %v1257_v62  ;;  %v1245_v11 = vld [vmem:[#allocation5 + $0x204] sm:$0xf0]  ;;  %v1337_v54 = vld [vmem:[#allocation5 + $0x184] sm:$0xf]  ;;  %v1339_v61 = vld [vmem:[#allocation5 + $0x190] sm:$0xf0] }
  0x42   :  { %806 = vmatpush.bf16.msrb.mxu2 %v1036_v14  ;;  %834 = vmatpush.bf16.msrb.mxu3 %v1144_v30  ;;  %v1248_v14 = vor.u32 %v1352_v10, %v1245_v11  ;;  %v1221_v30 = vld [vmem:[#allocation5 + $0x1d4] sm:$0xf0]  ;;  %v1191_v60 = vld [vmem:[#allocation5 + $0x188] sm:$0xf]  ;;  %v1283_v62 = vld [vmem:[#allocation2 + $0x34] sm:$0xf] }
  0x43   :  { %699 = vmatmul.bf16.gmra.mxu2 %v1540_v19  ;;  %v1224_v35 = vor.u32 %v1346_v29, %v1221_v30  ;;  %v1192_v0 = vor.u32 %v1339_v61, %v1191_v60  ;;  %v1286_v2 = vld [vmem:[#allocation2 + $0x4c] sm:$0xf]  ;;  %s1490_s2 = smov [#allocation8]   ;;  %s927_s30 = sshll.u32 %s1669_s3, 4  ;;  %s928_s30 = int_to_ptr.hbm [resolvable:$true] %s927_s30 }
  0x44   :  { %s925_s27 = sshll.u32 %s1490_s2, 4  ;;  %s926_s27 = int_to_ptr.vmem [resolvable:$true] %s925_s27 }
  0x45   :  { %662 = vmatpush.bf16.msrb.mxu1 %v1112_v20  ;;  %749 = vmatpush.bf16.msrb.mxu0 %v1116_v22  ;;  %v1349_v20 = vld [vmem:[#allocation5 + $0x1e4] sm:$0xf]  ;;  %v1096_v22 = vor.u32 %v1315_v18, %v1095_v17 }
  0x46   :  { %807 = vmatpush.bf16.msrb.mxu2 %v1024_v40  ;;  %835 = vmatpush.bf16.msrb.mxu3 %v1132_v46  ;;  %v1236_v26 = vor.u32 %v1349_v20, %v1233_v21  ;;  %v987_v40 = vld [vmem:[#allocation2 + $0x50] sm:$0xf]  ;;  %v1348_v46 = vld [vmem:[#allocation5 + $0x1d8] sm:$0xf0] }
  0x47   :  { %728 = vmatmul.bf16.gmra.mxu3 %v1536_v15  ;;  %v1554_v44 = vor.u32 %v1288_v41, %v987_v40  ;;  %v1228_v49 = vor.u32 %v1348_v46, %v1227_v45 }
  0x49   :  { %663 = vmatpush.bf16.msrb.mxu1 %v1100_v34  ;;  %750 = vmatpush.bf16.msrb.mxu0 %v1104_v38  ;;  %v1240_v34 = vor.u32 %v1351_v33, %v1239_v31  ;;  %v1280_v38 = vld [vmem:[#allocation2 + $0x1c] sm:$0xf] }
  0x4a   :  { %808 = vmatpush.bf16.msrb.mxu2 %v1012_v51  ;;  %836 = vmatpush.bf16.msrb.mxu3 %v1120_v57  ;;  %v960_v43 = vor.u32 %v1280_v38, %v957_v39  ;;  %v1215_v51 = vld [vmem:[#allocation5 + $0x1b8] sm:$0xf] }
  0x4b   :  { %v1216_v53 = vor.u32 %v1345_v52, %v1215_v51 }
  0x4d   :  { %664 = vmatpush.bf16.msrb.mxu1 %v1088_v50  ;;  %751 = vmatpush.bf16.msrb.mxu0 %v1092_v55  ;;  %v1200_v50 = vor.u32 %v1340_v47, %v1197_v48  ;;  %v1185_v55 = vld [vmem:[#allocation5 + $0x18c] sm:$0xf0] }
  0x4e   :  { %809 = vmatpush.bf16.msrb.mxu2 %v1000_v3  ;;  %837 = vmatpush.bf16.msrb.mxu3 %v1108_v7  ;;  %v1188_v57 = vor.u32 %v1337_v54, %v1185_v55  ;;  %v981_v3 = vld [vmem:[#allocation2 + $0x54] sm:$0xf0] }
  0x4f   :  { %v984_v4 = vor.u32 %v1286_v2, %v981_v3 }
  0x50   :  { %665 = vmatmul.bf16.vlgmr.msrb.gmra.mxu1 %v1546_v9  ;;  %752 = vmatmul.bf16.vlgmr.msrb.gmra.mxu0 %v1546_v9 }
  0x51   :  { %773 = vmatpush.bf16.msra.mxu1 %v1272_v56  ;;  %860 = vmatpush.bf16.msra.mxu0 %v1276_v63  ;;  %v1203_v56 = vld [vmem:[#allocation5 + $0x1a0] sm:$0xf] }
  0x52   :  { %1369 = vmatpush.bf16.msra.mxu2 %v1276_v63  ;;  %838 = vmatpush.bf16.msrb.mxu3 %v1096_v22  ;;  %v1204_v59 = vor.u32 %v1342_v58, %v1203_v56  ;;  %v969_v63 = vld [vmem:[#allocation2 + $0x3c] sm:$0xf0] }
  0x53   :  { %704 = vmatmul.bf16.gmra.mxu2 %v1548_v12  ;;  %v972_v1 = vor.u32 %v1283_v62, %v969_v63 }
  0x55   :  { %774 = vmatpush.bf16.msra.mxu1 %v1260_v8  ;;  %861 = vmatpush.bf16.msra.mxu0 %v1264_v13 }
  0x56   :  { %1370 = vmatpush.bf16.msra.mxu2 %v1264_v13  ;;  %v172_v13 = vld [vmem:[#allocation7] sm:$0x7] }
  0x57   :  { %733 = vmatmul.bf16.gmra.mxu3 %v1528_v28 }
  0x59   :  { %775 = vmatpush.bf16.msra.mxu1 %v1248_v14  ;;  %862 = vmatpush.bf16.msra.mxu0 %v1252_v25 }
  0x5a   :  { %1371 = vmatpush.bf16.msra.mxu2 %v1252_v25 }
  0x5d   :  { %776 = vmatpush.bf16.msra.mxu1 %v1236_v26  ;;  %863 = vmatpush.bf16.msra.mxu0 %v1240_v34 }
  0x5e   :  { %1372 = vmatpush.bf16.msra.mxu2 %v1240_v34 }
  0x60   :  { %670 = vmatmul.bf16.gmra.mxu1 %v960_v43  ;;  %757 = vmatmul.bf16.gmra.mxu0 %v960_v43 }
  0x61   :  { %777 = vmatpush.bf16.msra.mxu1 %v1224_v35  ;;  %864 = vmatpush.bf16.msra.mxu0 %v1228_v49 }
  0x62   :  { %1373 = vmatpush.bf16.msra.mxu2 %v1228_v49 }
  0x63   :  { %709 = vmatmul.bf16.gmra.mxu2 %v1554_v44 }
  0x65   :  { %778 = vmatpush.bf16.msra.mxu1 %v1212_v42  ;;  %865 = vmatpush.bf16.msra.mxu0 %v1216_v53 }
  0x66   :  { %1374 = vmatpush.bf16.msra.mxu2 %v1216_v53 }
  0x67   :  { %738 = vmatmul.bf16.gmra.mxu3 %v1538_v16 }
  0x69   :  { %779 = vmatpush.bf16.msra.mxu1 %v1200_v50  ;;  %866 = vmatpush.bf16.msra.mxu0 %v1204_v59 }
  0x6a   :  { %1375 = vmatpush.bf16.msra.mxu2 %v1204_v59 }
  0x6d   :  { %780 = vmatpush.bf16.msra.mxu1 %v1188_v57  ;;  %867 = vmatpush.bf16.msra.mxu0 %v1192_v0 }
  0x6e   :  { %1376 = vmatpush.bf16.msra.mxu2 %v1192_v0 }
  0x70   :  { %675 = vmatmul.bf16.gmra.mxu1 %v972_v1  ;;  %762 = vmatmul.bf16.gmra.mxu0 %v972_v1 }
  0x73   :  { %810 = vmatmul.bf16.vlgmr.msrb.gmra.mxu2 %v1526_v27 }
  0x77   :  { %839 = vmatmul.bf16.vlgmr.msrb.gmra.mxu3 %v1546_v9 }
  0x80   :  { %680 = vmatmul.bf16.gmra.mxu1 %v984_v4  ;;  %767 = vmatmul.bf16.gmra.mxu0 %v984_v4 }
  0x83   :  { %815 = vmatmul.bf16.gmra.mxu2 %v1536_v15 }
  0x87   :  { %844 = vmatmul.bf16.gmra.mxu3 %v960_v43 }
  0x90   :  { %781 = vmatmul.bf16.vlgmr.msra.gmra.mxu1 %v1530_v32  ;;  %868 = vmatmul.bf16.vlgmr.msra.gmra.mxu0 %v1530_v32 }
  0x93   :  { %820 = vmatmul.bf16.gmra.mxu2 %v1528_v28 }
  0x97   :  { %849 = vmatmul.bf16.gmra.mxu3 %v972_v1 }
  0xa0   :  { %786 = vmatmul.bf16.gmra.mxu1 %v1540_v19  ;;  %873 = vmatmul.bf16.gmra.mxu0 %v1540_v19 }
  0xa3   :  { %825 = vmatmul.bf16.gmra.mxu2 %v1538_v16 }
  0xa7   :  { %854 = vmatmul.bf16.gmra.mxu3 %v984_v4 }
  0xad   :  { %v637_v27 = vpop.f32.mrf.mxu0  ;;  %v647_v5 = vpop.f32.mrf.mxu1 }
  0xb0   :  { %791 = vmatmul.bf16.gmra.mxu1 %v1548_v12  ;;  %878 = vmatmul.bf16.gmra.mxu0 %v1548_v12  ;;  %v174_v12 = vperm.slane %v172_v13, 0 }
  0xb2   :  { %v638_v17 = vadd.f32 %v637_v27, %v174_v12  ;;  %v648_v49 = vadd.f32 %v647_v5, %v174_v12  ;;  %v1613_v5 = vperm.slane %v172_v13, 1 }
  0xb3   :  { %883 = vmatmul.bf16.vlgmr.msra.gmra.mxu2 %v1554_v44 }
  0xb5   :  { %v639_v32 = vpop.f32.mrf.mxu0  ;;  %v649_v6 = vpop.f32.mrf.mxu1 }
  0xb6   :  { %v695_v15 = vpop.f32.mrf.mxu2  ;;  %v640_v25 = vadd.f32 %v639_v32, %v174_v12  ;;  %v650_v56 = vadd.f32 %v649_v6, %v174_v12  ;;  %v1615_v32 = vperm.slane %v172_v13, 2 }
  0xba   :  { %v1570_v28 = vpop.f32.mrf.mxu3 }
  0xbd   :  { %v642_v8 = vpop.f32.mrf.mxu0  ;;  %v652_v9 = vpop.f32.mrf.mxu1 }
  0xbe   :  { %v697_v7 = vpop.f32.mrf.mxu2  ;;  %v643_v35 = vadd.f32 %v642_v8, %v174_v12  ;;  %v653_v63 = vadd.f32 %v652_v9, %v174_v12  ;;  %v725_v9 = vadd.f32 %v1570_v28, %v1613_v5 }
  0xc0   :  { %796 = vmatmul.bf16.gmra.mxu1 %v1554_v44 }
  0xc2   :  { %v1572_v19 = vpop.f32.mrf.mxu3 }
  0xc3   :  { %v727_v28 = vadd.f32 %v1572_v19, %v1613_v5 }
  0xc5   :  { %v644_v10 = vpop.f32.mrf.mxu0  ;;  %v654_v11 = vpop.f32.mrf.mxu1 }
  0xc6   :  { %v700_v16 = vpop.f32.mrf.mxu2  ;;  %v645_v42 = vadd.f32 %v644_v10, %v174_v12 }
  0xca   :  { %v1575_v14 = vpop.f32.mrf.mxu3 }
  0xcd   :  { %v666_v20 = vpop.f32.mrf.mxu1  ;;  %v753_v21 = vpop.f32.mrf.mxu0 }
  0xce   :  { %v702_v18 = vpop.f32.mrf.mxu2  ;;  %v667_v22 = vadd.f32 %v666_v20, %v638_v17  ;;  %v754_v20 = vadd.f32 %v753_v21, %v725_v9 }
  0xd0   :  { %v1579_v24 = vadd.f32 %v695_v15, %v667_v22  ;;  %v655_v15 = vadd.f32 %v654_v11, %v174_v12 }
  0xd2   :  { %v1577_v23 = vpop.f32.mrf.mxu3 }
  0xd5   :  { %v668_v29 = vpop.f32.mrf.mxu1  ;;  %v1581_v30 = vpop.f32.mrf.mxu0 }
  0xd6   :  { %v705_v26 = vpop.f32.mrf.mxu2  ;;  %v669_v31 = vadd.f32 %v668_v29, %v640_v25 }
  0xd8   :  { %v1585_v34 = vadd.f32 %v697_v7, %v669_v31 }
  0xda   :  { %v1583_v33 = vpop.f32.mrf.mxu3 }
  0xdd   :  { %v671_v37 = vpop.f32.mrf.mxu1  ;;  %v1587_v38 = vpop.f32.mrf.mxu0 }
  0xde   :  { %v707_v36 = vpop.f32.mrf.mxu2  ;;  %v672_v39 = vadd.f32 %v671_v37, %v643_v35  ;;  %v756_v37 = vadd.f32 %v1581_v30, %v727_v28 }
  0xe0   :  { %v1591_v41 = vadd.f32 %v700_v16, %v672_v39 }
  0xe2   :  { %v1589_v40 = vpop.f32.mrf.mxu3 }
  0xe5   :  { %v673_v44 = vpop.f32.mrf.mxu1  ;;  %v1593_v45 = vpop.f32.mrf.mxu0 }
  0xe6   :  { %v710_v43 = vpop.f32.mrf.mxu2  ;;  %v674_v46 = vadd.f32 %v673_v44, %v645_v42 }
  0xe8   :  { %v1597_v48 = vadd.f32 %v702_v18, %v674_v46 }
  0xea   :  { %v1595_v47 = vpop.f32.mrf.mxu3 }
  0xed   :  { %v676_v51 = vpop.f32.mrf.mxu1  ;;  %v1599_v52 = vpop.f32.mrf.mxu0 }
  0xee   :  { %v712_v50 = vpop.f32.mrf.mxu2  ;;  %v677_v53 = vadd.f32 %v676_v51, %v648_v49  ;;  %v730_v49 = vadd.f32 %v1575_v14, %v1613_v5 }
  0xf0   :  { %v1603_v55 = vadd.f32 %v705_v26, %v677_v53  ;;  %v759_v53 = vadd.f32 %v1587_v38, %v730_v49 }
  0xf2   :  { %v1601_v54 = vpop.f32.mrf.mxu3 }
  0xf5   :  { %v678_v58 = vpop.f32.mrf.mxu1  ;;  %v1605_v59 = vpop.f32.mrf.mxu0 }
  0xf6   :  { %v811_v57 = vpop.f32.mrf.mxu2  ;;  %v679_v60 = vadd.f32 %v678_v58, %v650_v56 }
  0xf7   :  { %v812_v17 = vadd.f32 %v811_v57, %v1615_v32 }
  0xf8   :  { %v1607_v62 = vadd.f32 %v707_v36, %v679_v60 }
  0xfa   :  { %v840_v61 = vpop.f32.mrf.mxu3 }
  0xfb   :  { %v841_v22 = vadd.f32 %v840_v61, %v812_v17 }
  0xfd   :  { %v681_v1 = vpop.f32.mrf.mxu1  ;;  %v1609_v2 = vpop.f32.mrf.mxu0 }
  0xfe   :  { %v813_v0 = vpop.f32.mrf.mxu2  ;;  %v682_v3 = vadd.f32 %v681_v1, %v653_v63 }
  0xff   :  { %v814_v29 = vadd.f32 %v813_v0, %v1615_v32 }
 0x100   :  { %v1611_v27 = vadd.f32 %v710_v43, %v682_v3 }
 0x102   :  { %v842_v4 = vpop.f32.mrf.mxu3 }
 0x103   :  { %v843_v21 = vadd.f32 %v842_v4, %v814_v29 }
 0x105   :  { %v683_v7 = vpop.f32.mrf.mxu1  ;;  %v1617_v8 = vpop.f32.mrf.mxu0 }
 0x106   :  { %v816_v6 = vpop.f32.mrf.mxu2  ;;  %v684_v16 = vadd.f32 %v683_v7, %v655_v15 }
 0x108   :  { %v1622_v18 = vadd.f32 %v712_v50, %v684_v16 }
 0x10a   :  { %v845_v10 = vpop.f32.mrf.mxu3 }
 0x10d   :  { %v782_v26 = vpop.f32.mrf.mxu1  ;;  %v869_v11 = vpop.f32.mrf.mxu0 }
 0x10e   :  { %v818_v25 = vpop.f32.mrf.mxu2  ;;  %v783_v13 = vadd.f32 %v782_v26, %v754_v20  ;;  %v870_v12 = vadd.f32 %v869_v11, %v841_v22 }
 0x10f   :  { %v819_v63 = vadd.f32 %v818_v25, %v1615_v32 }
 0x110   :  { %v889_v31 = vpack.c.bf16 %v783_v13, %v1579_v24  ;;  %v890_v35 = vpack.c.bf16 %v870_v12, %v870_v12  ;;  %v817_v24 = vadd.f32 %v816_v6, %v1615_v32 }
 0x112   :  { %v847_v36 = vpop.f32.mrf.mxu3  ;;  %905 = vst [vmem:[#allocation8] sm:$0xff] %v889_v31  ;;  %v846_v30 = vadd.f32 %v845_v10, %v817_v24  ;;  %v735_v10 = vadd.f32 %v1583_v33, %v1613_v5 }
 0x113   :  { %906 = vst [vmem:[#allocation8 + $0x8] sm:$0xf] %v890_v35  ;;  %v848_v3 = vadd.f32 %v847_v36, %v819_v63 }
 0x115   :  { %v784_v42 = vpop.f32.mrf.mxu1  ;;  %v871_v43 = vpop.f32.mrf.mxu0 }
 0x116   :  { %v821_v39 = vpop.f32.mrf.mxu2  ;;  %v785_v44 = vadd.f32 %v784_v42, %v756_v37  ;;  %v872_v46 = vadd.f32 %v871_v43, %v843_v21 }
 0x118   :  { %v891_v50 = vpack.c.bf16 %v785_v44, %v1585_v34  ;;  %v892_v51 = vpack.c.bf16 %v872_v46, %v872_v46  ;;  %v732_v34 = vadd.f32 %v1577_v23, %v1613_v5  ;;  %v764_v23 = vadd.f32 %v1599_v52, %v735_v10 }
 0x11a   :  { %907 = vst [vmem:[#allocation8 + $0xc] sm:$0xff] %v891_v50  ;;  %v850_v19 = vpop.f32.mrf.mxu3  ;;  %v761_v1 = vadd.f32 %v1593_v45, %v732_v34 }
 0x11b   :  { %908 = vst [vmem:[#allocation8 + $0x14] sm:$0xf] %v892_v51 }
 0x11d   :  { %v787_v57 = vpop.f32.mrf.mxu1  ;;  %v874_v58 = vpop.f32.mrf.mxu0 }
 0x11e   :  { %v823_v56 = vpop.f32.mrf.mxu2  ;;  %v788_v60 = vadd.f32 %v787_v57, %v759_v53  ;;  %v875_v61 = vadd.f32 %v874_v58, %v846_v30 }
 0x11f   :  { %v824_v33 = vadd.f32 %v823_v56, %v1615_v32 }
 0x120   :  { %v893_v14 = vpack.c.bf16 %v788_v60, %v1591_v41  ;;  %v894_v0 = vpack.c.bf16 %v875_v61, %v875_v61  ;;  %v822_v41 = vadd.f32 %v821_v39, %v1615_v32 }
 0x122   :  { %909 = vst [vmem:[#allocation8 + $0x18] sm:$0xff] %v893_v14  ;;  %v852_v38 = vpop.f32.mrf.mxu3  ;;  %v851_v45 = vadd.f32 %v850_v19, %v822_v41 }
 0x123   :  { %910 = vst [vmem:[#allocation8 + $0x20] sm:$0xf] %v894_v0  ;;  %v853_v36 = vadd.f32 %v852_v38, %v824_v33 }
 0x125   :  { %v789_v15 = vpop.f32.mrf.mxu1  ;;  %v876_v6 = vpop.f32.mrf.mxu0 }
 0x126   :  { %v826_v4 = vpop.f32.mrf.mxu2  ;;  %v790_v7 = vadd.f32 %v789_v15, %v761_v1  ;;  %v877_v16 = vadd.f32 %v876_v6, %v848_v3 }
 0x127   :  { %v827_v12 = vadd.f32 %v826_v4, %v1615_v32 }
 0x128   :  { %v895_v9 = vpack.c.bf16 %v790_v7, %v1597_v48  ;;  %v896_v17 = vpack.c.bf16 %v877_v16, %v877_v16  ;;  %v737_v48 = vadd.f32 %v1589_v40, %v1613_v5 }
 0x12a   :  { %911 = vst [vmem:[#allocation8 + $0x24] sm:$0xff] %v895_v9  ;;  %v855_v26 = vpop.f32.mrf.mxu3  ;;  %v766_v52 = vadd.f32 %v1605_v59, %v737_v48 }
 0x12b   :  { %912 = vst [vmem:[#allocation8 + $0x2c] sm:$0xf] %v896_v17  ;;  %v856_v35 = vadd.f32 %v855_v26, %v827_v12 }
 0x12d   :  { %v792_v22 = vpop.f32.mrf.mxu1  ;;  %v879_v25 = vpop.f32.mrf.mxu0 }
 0x12e   :  { %v828_v20 = vpop.f32.mrf.mxu2  ;;  %v793_v11 = vadd.f32 %v792_v22, %v764_v23  ;;  %v880_v13 = vadd.f32 %v879_v25, %v851_v45 }
 0x12f   :  { %v829_v44 = vadd.f32 %v828_v20, %v1615_v32 }
 0x130   :  { %v897_v29 = vpack.c.bf16 %v793_v11, %v1603_v55  ;;  %v898_v31 = vpack.c.bf16 %v880_v13, %v880_v13  ;;  %v740_v55 = vadd.f32 %v1595_v47, %v1613_v5  ;;  %v742_v47 = vadd.f32 %v1601_v54, %v1613_v5 }
 0x132   :  { %913 = vst [vmem:[#allocation8 + $0x30] sm:$0xff] %v897_v29  ;;  %v857_v49 = vpop.f32.mrf.mxu3  ;;  %v769_v50 = vadd.f32 %v1609_v2, %v740_v55 }
 0x133   :  { %914 = vst [vmem:[#allocation8 + $0x38] sm:$0xf] %v898_v31  ;;  %v858_v59 = vadd.f32 %v857_v49, %v829_v44 }
 0x135   :  { %v794_v21 = vpop.f32.mrf.mxu1  ;;  %v881_v39 = vpop.f32.mrf.mxu0 }
 0x136   :  { %v884_v28 = vpop.f32.mrf.mxu2  ;;  %v795_v42 = vadd.f32 %v794_v21, %v766_v52  ;;  %v882_v43 = vadd.f32 %v881_v39, %v853_v36 }
 0x137   :  { %v885_v37 = vadd.f32 %v884_v28, %v856_v35 }
 0x138   :  { %v899_v40 = vpack.c.bf16 %v795_v42, %v1607_v62  ;;  %v900_v24 = vpack.c.bf16 %v882_v43, %v882_v43  ;;  %v771_v62 = vadd.f32 %v1617_v8, %v742_v47 }
 0x139   :  { %v902_v46 = vpack.c.bf16 %v885_v37, %v885_v37 }
 0x13a   :  { %915 = vst [vmem:[#allocation8 + $0x3c] sm:$0xff] %v899_v40 }
 0x13b   :  { %918 = vst [vmem:[#allocation8 + $0x50] sm:$0xf] %v902_v46 }
 0x13c   :  { %916 = vst [vmem:[#allocation8 + $0x44] sm:$0xf] %v900_v24 }
 0x13d   :  { %v797_v53 = vpop.f32.mrf.mxu1 }
 0x13e   :  { %v886_v51 = vpop.f32.mrf.mxu2  ;;  %v798_v30 = vadd.f32 %v797_v53, %v769_v50 }
 0x13f   :  { %v887_v19 = vadd.f32 %v886_v51, %v858_v59 }
 0x140   :  { %v901_v32 = vpack.c.bf16 %v798_v30, %v1611_v27 }
 0x141   :  { %v904_v56 = vpack.c.bf16 %v887_v19, %v887_v19 }
 0x142   :  { %917 = vst [vmem:[#allocation8 + $0x48] sm:$0xff] %v901_v32 }
 0x143   :  { %920 = vst [vmem:[#allocation8 + $0x5c] sm:$0xf] %v904_v56 }
 0x145   :  { %v799_v57 = vpop.f32.mrf.mxu1 }
 0x146   :  { %v800_v2 = vadd.f32 %v799_v57, %v771_v62 }
 0x148   :  { %v903_v58 = vpack.c.bf16 %v800_v2, %v1622_v18 }
 0x14a   :  { %919 = vst [vmem:[#allocation8 + $0x54] sm:$0xff] %v903_v58 }
 0x14b   :  { %933 = dma.vmem_to_hbm [thread:$0]  %s926_s27, 1536, %s928_s30, [#allocation4], %s1486_s20, %s1486_s20, %s1487_s21  }
 0x14c   :  { %1483 = dma.done.wait [#allocation4], 1536  }
 0x14d   :  { %1484 = vsyncadd [#allocation4], 4294965760 }
 0x14e   :  { %938 = vsyncpa [#allocation3], 1 }
 0x14f   :  { %939 = vsyncpa [#allocation6], 1 }
 0x150   :  { %940 = vsyncpa [#allocation4], 1 }

</bundles_post_ra>
